<compile_context>
chip_gen: v5e
topology: v5e:2x2
jax: 0.10.0
libtpu: 0.0.40
codegen_flags: <defaults>
</compile_context>

<pallas_src>
import functools

import jax
import jax.numpy as jnp
from jax import lax
from jax.experimental import pallas as pl
from jax.experimental.pallas import tpu as pltpu


def _round_up(x, m):
    return ((x + m - 1) // m) * m


def _unpool_kernel(x_ref, o_ref, *, stride):
    # x_ref: (Br, W)          input rows (each row = one image row of one (n, c))
    # o_ref: (Br, s * W * s)  output rows; columns [0, W*s) are the p=0 plane
    #                         (value row, zero-stuffed along lanes), columns
    #                         [W*s, s*W*s) are the p>=1 planes (all zeros).
    x = x_ref[...]
    br, w = x.shape
    ws = w * stride
    total = o_ref.shape[1]  # s * W * s

    # 0/1 upsampling matrix U[j, k] = 1 iff k == j*s, so (x @ U)[r, j*s] = x[r, j]
    # and zeros elsewhere. Runs on the otherwise-idle MXU; lane interleave for free.
    row_ids = lax.broadcasted_iota(jnp.int32, (w, ws), 0)
    col_ids = lax.broadcasted_iota(jnp.int32, (w, ws), 1)
    u = (col_ids == row_ids * stride).astype(x.dtype)
    y = jnp.dot(x, u, preferred_element_type=jnp.float32)

    o_ref[:, :ws] = y.astype(o_ref.dtype)
    if stride > 1:  # static Python condition
        o_ref[:, ws:] = jnp.zeros((br, total - ws), o_ref.dtype)


def unpool(x, weights, stride, *, block_rows=None, vmem_budget_bytes=4 * 1024 * 1024):
    """x: (N, C, H, W); weights: (C, 1, s, s) (delta kernel); returns (N, C, H*s, W*s)."""
    N, C, H, W = x.shape
    s = int(stride)
    assert weights.shape == (C, 1, s, s), weights.shape
    # Weight values are not used: the module always builds the delta kernel
    # (w[:, :, 0, 0] = 1, zeros elsewhere), so the forward is zero-stuffing.

    R = N * C * H
    Ws = W * s
    out_cols = s * Ws
    itemsize = jnp.dtype(x.dtype).itemsize

    # Pick the block row count from a conservative double-buffered VMEM budget
    # (fits the scoped-VMEM defaults of v5e/v6e/v7x).
    if block_rows is None:
        in_row_bytes = _round_up(W, 128) * itemsize
        out_row_bytes = _round_up(out_cols, 128) * itemsize
        per_row = 2 * (in_row_bytes + out_row_bytes)  # x2 for double buffering
        block_rows = max(1, vmem_budget_bytes // per_row)

    sublane = max(8, 32 // itemsize)  # 8 for f32, 16 for bf16, 32 for int8
    if block_rows >= R:
        block_rows = R  # full extent is always a legal block size
    else:
        block_rows = max(sublane, (block_rows // sublane) * sublane)

    x2 = x.reshape(R, W)  # free, row-major
    grid = (pl.cdiv(R, block_rows),)

    out2 = pl.pallas_call(
        functools.partial(_unpool_kernel, stride=s),
        out_shape=jax.ShapeDtypeStruct((R, out_cols), x.dtype),
        grid=grid,
        in_specs=[pl.BlockSpec((block_rows, W), lambda i: (i, 0))],
        out_specs=pl.BlockSpec((block_rows, out_cols), lambda i: (i, 0)),
        compiler_params=pltpu.CompilerParams(
            dimension_semantics=("parallel",),
            vmem_limit_bytes=32 * 1024 * 1024,
        ),
        cost_estimate=pl.CostEstimate(
            flops=2 * R * W * Ws,          # the upsampling matmul
            transcendentals=0,
            bytes_accessed=R * W * (1 + s * s) * itemsize,
        ),
    )(x2)

    # (R, s*W*s) row-major is exactly (N, C, H*s, W*s) row-major -> free reshape.
    return out2.reshape(N, C, H * s, W * s)


def make_unpool_weights(num_channels, stride, dtype=jnp.float32):
    # Deterministic init exactly as in the PyTorch module:
    # zeros of shape (C, 1, s, s) with [:, :, 0, 0] = 1.
    w = jnp.zeros((num_channels, 1, stride, stride), dtype=dtype)
    w = w.at[:, :, 0, 0].set(1.0)
    return w


if __name__ == "__main__":
    N, C, H, W = 2, 4, 16, 16
    stride = 2

    key = jax.random.PRNGKey(0)
    x = jax.random.normal(key, (N, C, H, W), dtype=jnp.float32)
    w = make_unpool_weights(C, stride)

    out = unpool(x, w, stride)
    out = jax.block_until_ready(out)

    # Reference: out[..., ::s, ::s] == x, zeros elsewhere.
    ref = jnp.zeros((N, C, H * stride, W * stride), dtype=x.dtype)
    ref = ref.at[:, :, ::stride, ::stride].set(x)

    assert out.shape == (N, C, H * stride, W * stride), out.shape
    assert jnp.allclose(out, ref, atol=0.0, rtol=0.0), "mismatch vs reference"

    print("KERNEL_OK")
</pallas_src>

<mosaic_0001>
module attributes {stable_mosaic.version = 11 : i64} {
  func.func @_unpool_kernel(%arg0: i32, %arg1: memref<128x16xf32, #tpu.memory_space<vmem>>, %arg2: memref<128x64xf32, #tpu.memory_space<vmem>>) attributes {dimension_semantics = [#tpu.dimension_semantics<parallel>], iteration_bounds = array<i64: 1>, scalar_prefetch = 0 : i64, scratch_operands = 0 : i64, tpu.core_type = #tpu.core_type<tc>, window_params = [{transform_indices = @transform_0, window_bounds = array<i64: 128, 16>}, {transform_indices = @transform_1, window_bounds = array<i64: 128, 64>}]} {
    %c0 = arith.constant 0 : index
    %c0_0 = arith.constant 0 : index
    %0 = vector.load %arg1[%c0, %c0_0] : memref<128x16xf32, #tpu.memory_space<vmem>>, vector<128x16xf32>
    %1 = tpu.iota {dimensions = array<i32: 0>} : vector<16x32xi32>
    %2 = tpu.iota {dimensions = array<i32: 1>} : vector<16x32xi32>
    %c2_i32 = arith.constant 2 : i32
    %3 = vector.broadcast %c2_i32 : i32 to vector<16x32xi32>
    %4 = arith.muli %1, %3 : vector<16x32xi32>
    %5 = arith.cmpi eq, %2, %4 : vector<16x32xi32>
    %6 = arith.extui %5 : vector<16x32xi1> to vector<16x32xi32>
    %7 = arith.sitofp %6 : vector<16x32xi32> to vector<16x32xf32>
    %cst = arith.constant dense<0.000000e+00> : vector<128x32xf32>
    %8 = tpu.matmul %0, %7, %cst {dimension_numbers = #tpu.dot_dimension_numbers<[1], [0], [0], [1], [0, 0, 1, 1], [], []>} : vector<128x16xf32>, vector<16x32xf32>, vector<128x32xf32> -> vector<128x32xf32>
    %c0_1 = arith.constant 0 : index
    %c0_2 = arith.constant 0 : index
    %9 = vector.load %arg2[%c0_1, %c0_2] : memref<128x64xf32, #tpu.memory_space<vmem>>, vector<128x32xf32>
    tpu.vector_store %arg2[%c0_1, %c0_2], %8 {strides = array<i32>} : memref<128x64xf32, #tpu.memory_space<vmem>>, vector<128x32xf32>,
    %cst_3 = arith.constant 0.000000e+00 : f32
    %10 = vector.broadcast %cst_3 : f32 to vector<128x32xf32>
    %c0_4 = arith.constant 0 : index
    %c32 = arith.constant 32 : index
    %11 = vector.load %arg2[%c0_4, %c32] : memref<128x64xf32, #tpu.memory_space<vmem>>, vector<128x32xf32>
    tpu.vector_store %arg2[%c0_4, %c32], %10 {strides = array<i32>} : memref<128x64xf32, #tpu.memory_space<vmem>>, vector<128x32xf32>,
    return
  }
  func.func @transform_0(%arg0: i32) -> (i32, i32) {
    %c0_i32 = arith.constant 0 : i32
    %c0_i32_0 = arith.constant 0 : i32
    return %arg0, %c0_i32 : i32, i32
  }
  func.func @transform_1(%arg0: i32) -> (i32, i32) {
    %c0_i32 = arith.constant 0 : i32
    %c0_i32_0 = arith.constant 0 : i32
    return %arg0, %c0_i32 : i32, i32
  }
}

</mosaic_0001>

<bundles_post_ra>
// kernel: tpu_custom_call.1
= control target key start
LH: loop header
LB: loop body
LE: loop exit
PB: predicated region body
PF: predicated region fallthrough
CT: control target
= control target key end

     0   :  { %v24_v0 = vlaneseq  ;;  %v217_v7 = vmov 1.0   ;;  %vm37_vm2 = vcmask 130048   ;;  %vm151_vm3 = vcmask 261120   ;;  %s433_s0 = inlined_call_operand.vmem [shape: f32[128,16], index: 0, kind: input, shape index: {}]   ;;  %s434_s1 = inlined_call_operand.vmem [shape: f32[128,64], index: 1, kind: output, shape index: {}]  }
   0x1   :  { %v16_v8 = vld [vmem:[%s433_s0 + $0x40] sm:$0xff]  ;;  %v17_v12 = vld [vmem:[%s433_s0 + $0x48] sm:$0xff]  ;;  %v18_v16 = vld [vmem:[%s433_s0 + $0x50] sm:$0xff]  ;;  %vm168_vm4 = vcmask 523520   ;;  %v218_v26 = vmov 0.0  }
   0x2   :  { %v25_v1 = vshrl.u32 %v24_v0, 7  ;;  %v28_v3 = vand.u32 127, %v24_v0  ;;  %v20_v9 = vld [vmem:[%s433_s0 + $0x60] sm:$0xff]  ;;  %v21_v13 = vld [vmem:[%s433_s0 + $0x68] sm:$0xff]  ;;  %v22_v17 = vld [vmem:[%s433_s0 + $0x70] sm:$0xff] }
   0x3   :  { %v8_v10 = vld [vmem:[%s433_s0] sm:$0xff]  ;;  %v9_v14 = vld [vmem:[%s433_s0 + $0x8] sm:$0xff]  ;;  %v10_v18 = vld [vmem:[%s433_s0 + $0x10] sm:$0xff] }
   0x4   :  { %v26_v2 = vadd.s32 8, %v25_v1  ;;  %v29_v4 = vmul.u32 2, %v25_v1  ;;  %v12_v11 = vld [vmem:[%s433_s0 + $0x20] sm:$0xff]  ;;  %v13_v15 = vld [vmem:[%s433_s0 + $0x28] sm:$0xff]  ;;  %v14_v19 = vld [vmem:[%s433_s0 + $0x30] sm:$0xff] }
   0x5   :  { %v19_v20 = vld [vmem:[%s433_s0 + $0x58] sm:$0xff] }
   0x6   :  { %v30_v5 = vmul.u32 2, %v26_v2  ;;  %vm229_vm1 = vcmp.eq.s32.totalorder %v28_v3, %v29_v4  ;;  %v23_v21 = vld [vmem:[%s433_s0 + $0x78] sm:$0xff] }
   0x7   :  { %v11_v22 = vld [vmem:[%s433_s0 + $0x18] sm:$0xff] }
   0x8   :  { %vm32_vm0 = vcmp.eq.s32.totalorder %v28_v3, %v30_v5  ;;  %v15_v23 = vld [vmem:[%s433_s0 + $0x38] sm:$0xff] }
   0x9   :  { %210 = vmatpush.msk.msra.mxu2 %vm32_vm0, %v217_v7  ;;  %211 = vmatpush.msk.msra.mxu3 %vm32_vm0, %v217_v7 }
   0xa   :  { %191 = vmatpush.msk.msra.mxu0 %vm32_vm0, %v217_v7  ;;  %209 = vmatpush.msk.msra.mxu1 %vm32_vm0, %v217_v7 }
   0xb   :  { %213 = vmatpush.msk.msra.mxu2 %vm229_vm1, %v217_v7  ;;  %214 = vmatpush.msk.msra.mxu3 %vm229_vm1, %v217_v7 }
   0xc   :  { %201 = vmatmul.msk.f32.vlgmr.msra.gmra.mxu2 %vm37_vm2, %v16_v8  ;;  %205 = vmatmul.msk.f32.vlgmr.msra.gmra.mxu3 %vm37_vm2, %v20_v9 }
   0xd   :  { %192 = vmatpush.msk.msra.mxu0 %vm229_vm1, %v217_v7  ;;  %212 = vmatpush.msk.msra.mxu1 %vm229_vm1, %v217_v7 }
   0xe   :  { %193 = vmatmul.msk.f32.vlgmr.msra.gmra.mxu0 %vm37_vm2, %v8_v10  ;;  %197 = vmatmul.msk.f32.vlgmr.msra.gmra.mxu1 %vm37_vm2, %v12_v11 }
  0x14   :  { %202 = vmatmul.msk.f32.gmra.mxu2 %vm37_vm2, %v17_v12  ;;  %206 = vmatmul.msk.f32.gmra.mxu3 %vm37_vm2, %v21_v13 }
  0x16   :  { %194 = vmatmul.msk.f32.gmra.mxu0 %vm37_vm2, %v9_v14  ;;  %198 = vmatmul.msk.f32.gmra.mxu1 %vm37_vm2, %v13_v15 }
  0x1c   :  { %203 = vmatmul.msk.f32.gmra.mxu2 %vm37_vm2, %v18_v16  ;;  %207 = vmatmul.msk.f32.gmra.mxu3 %vm37_vm2, %v22_v17 }
  0x1e   :  { %195 = vmatmul.msk.f32.gmra.mxu0 %vm37_vm2, %v10_v18  ;;  %199 = vmatmul.msk.f32.gmra.mxu1 %vm37_vm2, %v14_v19 }
  0x24   :  { %204 = vmatmul.msk.f32.gmra.mxu2 %vm37_vm2, %v19_v20  ;;  %208 = vmatmul.msk.f32.gmra.mxu3 %vm37_vm2, %v23_v21 }
  0x26   :  { %196 = vmatmul.msk.f32.gmra.mxu0 %vm37_vm2, %v11_v22  ;;  %200 = vmatmul.msk.f32.gmra.mxu1 %vm37_vm2, %v15_v23 }
  0x8b   :  { %v103_v24 = vpop.f32.mrf.mxu0  ;;  %v115_v25 = vpop.f32.mrf.mxu1 }
  0x8c   :  { %152 = vst.msk [vmem:[%s434_s1] sm:$0xff] %vm151_vm3, %v103_v24 }
  0x8d   :  { %169 = vst.msk [vmem:[%s434_s1] sm:$0xff] %vm168_vm4, %v218_v26 }
  0x8e   :  { %156 = vst.msk [vmem:[%s434_s1 + $0x20] sm:$0xff] %vm151_vm3, %v115_v25 }
  0x8f   :  { %173 = vst.msk [vmem:[%s434_s1 + $0x20] sm:$0xff] %vm168_vm4, %v218_v26  ;;  %v127_v27 = vpop.f32.mrf.mxu2  ;;  %v139_v28 = vpop.f32.mrf.mxu3 }
  0x90   :  { %160 = vst.msk [vmem:[%s434_s1 + $0x40] sm:$0xff] %vm151_vm3, %v127_v27 }
  0x91   :  { %177 = vst.msk [vmem:[%s434_s1 + $0x40] sm:$0xff] %vm168_vm4, %v218_v26 }
  0x92   :  { %164 = vst.msk [vmem:[%s434_s1 + $0x60] sm:$0xff] %vm151_vm3, %v139_v28 }
  0x93   :  { %181 = vst.msk [vmem:[%s434_s1 + $0x60] sm:$0xff] %vm168_vm4, %v218_v26  ;;  %v106_v29 = vpop.f32.mrf.mxu0  ;;  %v118_v30 = vpop.f32.mrf.mxu1 }
  0x94   :  { %153 = vst.msk [vmem:[%s434_s1 + $0x8] sm:$0xff] %vm151_vm3, %v106_v29 }
  0x95   :  { %170 = vst.msk [vmem:[%s434_s1 + $0x8] sm:$0xff] %vm168_vm4, %v218_v26 }
  0x96   :  { %157 = vst.msk [vmem:[%s434_s1 + $0x28] sm:$0xff] %vm151_vm3, %v118_v30 }
  0x97   :  { %174 = vst.msk [vmem:[%s434_s1 + $0x28] sm:$0xff] %vm168_vm4, %v218_v26  ;;  %v130_v31 = vpop.f32.mrf.mxu2  ;;  %v142_v32 = vpop.f32.mrf.mxu3 }
  0x98   :  { %161 = vst.msk [vmem:[%s434_s1 + $0x48] sm:$0xff] %vm151_vm3, %v130_v31 }
  0x99   :  { %178 = vst.msk [vmem:[%s434_s1 + $0x48] sm:$0xff] %vm168_vm4, %v218_v26 }
  0x9a   :  { %165 = vst.msk [vmem:[%s434_s1 + $0x68] sm:$0xff] %vm151_vm3, %v142_v32 }
  0x9b   :  { %182 = vst.msk [vmem:[%s434_s1 + $0x68] sm:$0xff] %vm168_vm4, %v218_v26  ;;  %v109_v33 = vpop.f32.mrf.mxu0  ;;  %v121_v34 = vpop.f32.mrf.mxu1 }
  0x9c   :  { %154 = vst.msk [vmem:[%s434_s1 + $0x10] sm:$0xff] %vm151_vm3, %v109_v33 }
  0x9d   :  { %171 = vst.msk [vmem:[%s434_s1 + $0x10] sm:$0xff] %vm168_vm4, %v218_v26 }
  0x9e   :  { %158 = vst.msk [vmem:[%s434_s1 + $0x30] sm:$0xff] %vm151_vm3, %v121_v34 }
  0x9f   :  { %175 = vst.msk [vmem:[%s434_s1 + $0x30] sm:$0xff] %vm168_vm4, %v218_v26  ;;  %v133_v35 = vpop.f32.mrf.mxu2  ;;  %v145_v36 = vpop.f32.mrf.mxu3 }
  0xa0   :  { %162 = vst.msk [vmem:[%s434_s1 + $0x50] sm:$0xff] %vm151_vm3, %v133_v35 }
  0xa1   :  { %179 = vst.msk [vmem:[%s434_s1 + $0x50] sm:$0xff] %vm168_vm4, %v218_v26 }
  0xa2   :  { %166 = vst.msk [vmem:[%s434_s1 + $0x70] sm:$0xff] %vm151_vm3, %v145_v36 }
  0xa3   :  { %183 = vst.msk [vmem:[%s434_s1 + $0x70] sm:$0xff] %vm168_vm4, %v218_v26  ;;  %v112_v37 = vpop.f32.mrf.mxu0  ;;  %v124_v38 = vpop.f32.mrf.mxu1 }
  0xa4   :  { %155 = vst.msk [vmem:[%s434_s1 + $0x18] sm:$0xff] %vm151_vm3, %v112_v37 }
  0xa5   :  { %172 = vst.msk [vmem:[%s434_s1 + $0x18] sm:$0xff] %vm168_vm4, %v218_v26 }
  0xa6   :  { %159 = vst.msk [vmem:[%s434_s1 + $0x38] sm:$0xff] %vm151_vm3, %v124_v38 }
  0xa7   :  { %176 = vst.msk [vmem:[%s434_s1 + $0x38] sm:$0xff] %vm168_vm4, %v218_v26  ;;  %v136_v39 = vpop.f32.mrf.mxu2  ;;  %v148_v40 = vpop.f32.mrf.mxu3 }
  0xa8   :  { %163 = vst.msk [vmem:[%s434_s1 + $0x58] sm:$0xff] %vm151_vm3, %v136_v39 }
  0xa9   :  { %180 = vst.msk [vmem:[%s434_s1 + $0x58] sm:$0xff] %vm168_vm4, %v218_v26 }
  0xaa   :  { %167 = vst.msk [vmem:[%s434_s1 + $0x78] sm:$0xff] %vm151_vm3, %v148_v40 }
  0xab   :  { %184 = vst.msk [vmem:[%s434_s1 + $0x78] sm:$0xff] %vm168_vm4, %v218_v26 }

</bundles_post_ra>
